<compile_context>
chip_gen: v6e
topology: v6e:2x2x1
jax: 0.10.0
libtpu: 0.0.40
codegen_flags: <defaults>
</compile_context>

<pallas_src>
import jax
import jax.numpy as jnp
from jax.experimental import pallas as pl
from jax.experimental.pallas import tpu as pltpu


def _pos_copy_kernel(emb_ref, out_ref):
    # emb_ref: VMEM (tile_rows, C) — chunk of the flattened positional rows.
    # out_ref: VMEM (tile_rows, C) — same chunk for the current batch row
    #          (the batch dim is squeezed out by the BlockSpec).
    out_ref[...] = emb_ref[...]


def _sublane_pack(itemsize):
    # Rows sharing one 32-bit sublane group: f32 -> 8, bf16 -> 16, int8 -> 32.
    return 8 * max(1, 4 // itemsize)


def _choose_layout(total_cols, itemsize, vmem_budget_bytes, lane_cap=4096):
    """Pick a per-batch-row view (R, C) with R * C == total_cols plus a
    row-block height tile_rows.

    C: a divisor of total_cols that is a multiple of 128 (unmasked lane
       stores); among those prefer the widest one that still leaves
       R >= sublane pack (unmasked sublane stores).  If total_cols has no
       128-multiple divisor, fall back to a single flat row (R = 1).
    tile_rows: largest pack-multiple whose double-buffered in+out blocks fit
       the VMEM budget (blocks are pack-multiples, so padded == nominal); when
       R < pack use the full extent R, which is always a legal block height.
    """
    pack = _sublane_pack(itemsize)

    cands = [c for c in range(128, min(total_cols, lane_cap) + 1, 128)
             if total_cols % c == 0]
    if not cands:
        C = total_cols                      # no 128-multiple divisor: flat row
    else:
        deep = [c for c in cands if total_cols // c >= pack]
        C = max(deep) if deep else max(cands)
    R = total_cols // C

    if R <= pack:
        tile_rows = R                       # full row extent -> legal block
    else:
        # 2x double-buffered input block + 2x output block, both (tile_rows, C):
        #   4 * tile_rows * C * itemsize <= budget   (tile_rows is a pack multiple,
        #   so the padded footprint equals the nominal one)
        max_rows = vmem_budget_bytes // (4 * C * itemsize)
        tile_rows = max(pack, (min(R, max_rows) // pack) * pack)
    return R, C, tile_rows


def positional_encoding(inputs, emb_table, *, vmem_budget_bytes=16 * 1024 * 1024):
    """Equivalent of PositionalEncoding.forward(inputs).

    inputs:    (batch, seq) int array (values unused, only the shape matters).
    emb_table: (max_pos, d_model) learned positional embedding table.
    returns:   (batch, seq, d_model) array of emb_table.dtype.
    """
    batch, seq = inputs.shape
    max_pos, d_model = emb_table.shape
    assert seq <= max_pos, "sequence length exceeds max_pos of the embedding table"

    total_cols = seq * d_model
    itemsize = jnp.dtype(emb_table.dtype).itemsize
    R, C, tile_rows = _choose_layout(total_cols, itemsize, vmem_budget_bytes)
    grid_rows = pl.cdiv(R, tile_rows)

    # pos = arange(seq) selects the first `seq` contiguous rows of the table;
    # view them per batch-row as (R, C).  (Contiguous slice + reshape; the
    # extra S*D read-side copy is negligible next to the B*S*D output.)
    emb_view = emb_table[:seq].reshape(R, C)

    out = pl.pallas_call(
        _pos_copy_kernel,
        out_shape=jax.ShapeDtypeStruct((batch, R, C), emb_table.dtype),
        # batch innermost: the emb block index repeats across it, so Pallas
        # fetches each emb chunk from HBM once and reuses it for every batch row.
        grid=(grid_rows, batch),
        in_specs=[pl.BlockSpec((tile_rows, C), lambda r, b: (r, 0))],
        out_specs=pl.BlockSpec((None, tile_rows, C), lambda r, b: (b, r, 0)),
        compiler_params=pltpu.CompilerParams(
            dimension_semantics=("parallel", "parallel"),
            vmem_limit_bytes=32 * 1024 * 1024,
        ),
    )(emb_view)

    return out.reshape(batch, seq, d_model)


if __name__ == "__main__":
    key = jax.random.PRNGKey(0)
    k_emb, k_ids = jax.random.split(key)

    # Shapes implied by the module (small).
    batch, seq = 2, 8
    d_model, max_pos = 32, 16

    # nn.Embedding default init: N(0, 1)
    emb_table = jax.random.normal(k_emb, (max_pos, d_model), dtype=jnp.float32)
    # token ids (values irrelevant to the forward pass, only the shape)
    inputs = jax.random.randint(k_ids, (batch, seq), 0, 100, dtype=jnp.int32)

    out = positional_encoding(inputs, emb_table)
    out = jax.block_until_ready(out)

    ref = jnp.broadcast_to(emb_table[:seq][None, :, :], (batch, seq, d_model))
    assert out.shape == (batch, seq, d_model)
    assert jnp.array_equal(out, ref)

    # Second config exercising the full-sublane row-block path (R >= 8).
    batch2, seq2, d_model2, max_pos2 = 2, 64, 128, 64
    emb_table2 = jax.random.normal(k_emb, (max_pos2, d_model2), dtype=jnp.float32)
    inputs2 = jnp.zeros((batch2, seq2), dtype=jnp.int32)
    out2 = jax.block_until_ready(positional_encoding(inputs2, emb_table2))
    ref2 = jnp.broadcast_to(emb_table2[:seq2][None, :, :], (batch2, seq2, d_model2))
    assert jnp.array_equal(out2, ref2)

    print("KERNEL_OK")
</pallas_src>

<mosaic_0001>
module attributes {stable_mosaic.version = 11 : i64} {
  func.func @_pos_copy_kernel(%arg0: i32, %arg1: i32, %arg2: memref<1x256xf32, #tpu.memory_space<vmem>>, %arg3: memref<1x1x256xf32, #tpu.memory_space<vmem>>) attributes {dimension_semantics = [#tpu.dimension_semantics<parallel>, #tpu.dimension_semantics<parallel>], iteration_bounds = array<i64: 1, 2>, scalar_prefetch = 0 : i64, scratch_operands = 0 : i64, tpu.core_type = #tpu.core_type<tc>, window_params = [{transform_indices = @transform_0, window_bounds = array<i64: 1, 256>}, {transform_indices = @transform_1, window_bounds = array<i64: 1, 1, 256>}]} {
    %c0 = arith.constant 0 : index
    %c0_0 = arith.constant 0 : index
    %0 = vector.load %arg2[%c0, %c0_0] : memref<1x256xf32, #tpu.memory_space<vmem>>, vector<1x256xf32>
    %c0_1 = arith.constant 0 : index
    %c0_2 = arith.constant 0 : index
    %c0_3 = arith.constant 0 : index
    %1 = vector.load %arg3[%c0_1, %c0_2, %c0_3] : memref<1x1x256xf32, #tpu.memory_space<vmem>>, vector<1x1x256xf32>
    %2 = vector.shape_cast %1 : vector<1x1x256xf32> to vector<1x256xf32>
    %3 = vector.shape_cast %0 : vector<1x256xf32> to vector<1x1x256xf32>
    tpu.vector_store %arg3[%c0_1, %c0_2, %c0_3], %3 {strides = array<i32>} : memref<1x1x256xf32, #tpu.memory_space<vmem>>, vector<1x1x256xf32>,
    return
  }
  func.func @transform_0(%arg0: i32, %arg1: i32) -> (i32, i32) {
    %c0_i32 = arith.constant 0 : i32
    %c0_i32_0 = arith.constant 0 : i32
    return %arg0, %c0_i32 : i32, i32
  }
  func.func @transform_1(%arg0: i32, %arg1: i32) -> (i32, i32, i32) {
    %c0_i32 = arith.constant 0 : i32
    %c0_i32_0 = arith.constant 0 : i32
    return %arg1, %arg0, %c0_i32 : i32, i32, i32
  }
}

</mosaic_0001>

<bundles_post_ra>
// kernel: tpu_custom_call.1
= control target key start
LH: loop header
LB: loop body
LE: loop exit
PB: predicated region body
PF: predicated region fallthrough
CT: control target
= control target key end

     0   :  { %6 = vsyncpa [#allocation3], 0  ;;  %s545_s0 = inlined_call_operand.hbm [shape: f32[1,256], index: 0, kind: input, shape index: {}]   ;;  %s546_s1 = inlined_call_operand.hbm [shape: f32[2,1,256], index: 1, kind: output, shape index: {}]  }
   0x1   :  { %7 = vsyncpa [#allocation4], 0 }
   0x2   :  { %9 = vsyncpa [#allocation4 + $0x1], 0  ;;  %s424_s6 = smov 0   ;;  %s426_s7 = smov 0  }
   0x3   :  { %s428_s8 = smov 0   ;;  %s430_s9 = smov 0  }
   0x4   :  { %s432_s10 = smov 0   ;;  %s434_s11 = smov 0  }
   0x5 LB: > { %s225_s12 = sadd.s32 4294967295, %s410_s11   ;;  %s226_s13 = sadd.s32 4294967294, %s410_s11   ;;  %s410_s11 = sphi %s434_s11, %s15_s11   ;;  %s406_s10 = sphi %s432_s10, %s555_s10   ;;  %s402_s9 = sphi %s430_s9, %s554_s9   ;;  %s398_s8 = sphi %s428_s8, %s553_s8   ;;  %s394_s7 = sphi %s426_s7, %s552_s7   ;;  %s390_s6 = sphi %s424_s6, %s551_s6  }
   0x6   : > { %s24_s14 = sadd.s32 1, %s406_s10  ;;  %s62_s15 = sadd.s32 1, %s398_s8 }
   0x7   : > { %p25_p0 = scmp.ge.s32.totalorder %s24_s14, 2  ;;  %p72_p1 = scmp.ne.s32.totalorder %s398_s8, %s394_s7 }
   0x8   : > { %p73_p2 = scmp.eq.s32.totalorder %s225_s12, 1  ;;  %p78_p3 = scmp.ne.s32.totalorder %s394_s7, %s390_s6 }
   0x9   : > { %s557_s14 = smov (%p25_p0, %s24_s14), 0  ;;  %p79_p5 = scmp.eq.s32.totalorder %s226_s13, 1 }
   0xa   : > { %p464_p4 = por %p73_p2, %p72_p1  ;;  %s57_s17 = ssub.s32 %s406_s10, %s557_s14 }
   0xb   : > { %p227_p6 = scmp.ge.s32.totalorder %s410_s11, 1  ;;  %p60_p7 = scmp.eq.s32.totalorder %s57_s17, 0 }
   0xc   : > { %p471_p8 = por %p79_p5, %p78_p3  ;;  %p86_p9 = scmp.lt.s32.totalorder %s410_s11, 3 }
   0xd   : > { %s477_s19 = scalar_select %p60_p7, %s398_s8, %s62_s15  }
   0xe   : > { %p479_p10 = pnand %p227_p6, %p86_p9  ;;  %p483_p11 = scmp.eq.s32.totalorder %s225_s12, 0 }
   0xf   : > { %s412_s22 = smov [#allocation2]  }
  0x10   : > { %p244_p12 = pneg %p479_p10  ;;  %s102_s23 = sshll.u32 %s412_s22, 4  ;;  %s103_s23 = int_to_ptr.vmem [resolvable:$true] %s102_s23 }
  0x11   : > { %s315_s24 = scalar_lea.vmem %s103_s23, 32  ;;  %p323_p5 = scmp.lt.s32.totalorder %s103_s23, %s103_s23 }
  0x12   : > { %p245_p13 = pnand %p483_p11, %p244_p12  ;;  %p316_p1 = scmp.ne.s32.totalorder %s103_s23, %s315_s24 }
  0x13   : > { %p324_p6 = scmp.lt.s32.totalorder %s315_s24, %s315_s24 }
  0x14   : > { %p306_p0 = pneg %p245_p13 }
  0x15   : > { %p325_p7 = por %p324_p6, %p323_p5 }
  0x16   : > { %p318_p2 = pnand %p316_p1, %p306_p0 }
  0x18   : > { %p319_p3 = pneg %p318_p2 }
  0x1a   : > { %p326_p9 = pnand %p325_p7, %p319_p3 }
  0x1c   : > { %329 = shalt.err (!%p326_p9)
}
  0x1d   : > { %247 = dma.hbm_to_vmem [thread:$0]  (!%p245_p13), %s545_s0, 32, %s103_s23, [#allocation3]  }
  0x1e   : > { %115 = sbr.rel (%p479_p10) target bundleno = 61 (0x3d), region = 24 }
  0x23   : > { %381 = dma.done.wait (%p483_p11), [#allocation3], 32  }
  0x24   : > { %383 = vsyncadd (%p483_p11), [#allocation3], 4294967264  ;;  %s127_s27 = sand.u32 1, %s394_s7   ;;  %v131_v0 = vlaneseq  ;;  %s237_s2 = sshll.u32 %s402_s9, 5  ;;  %v130_v1 = vld [vmem:[#allocation2] sm:$0x3] }
  0x25   : > { %s231_s28 = sshll.u32 %s127_s27, 1  ;;  %s151_s5 = scalar_lea.hbm %s546_s1, %s237_s2 }
  0x26   : > { %s129_s29 = scalar_lea.vmem [#allocation5], %s231_s28  ;;  %vm133_vm0 = vcmp.lt.s32.totalorder %v131_v0, 256  ;;  %s137_s12 = scalar_lea.sflag [#allocation4], %s127_s27 }
  0x27   : > { %s153_s30 = sshll.u32 %s129_s29, 4  ;;  %135 = vst.msk [vmem:[%s129_s29] sm:$0x3] %vm133_vm0, %v130_v1  ;;  %s413_s15 = smov [#allocation5]   ;;  %s502_s30 = int_to_ptr.vmem [resolvable:$true] %s153_s30 }
  0x28   : > { %s330_s13 = scalar_lea.vmem %s502_s30, 32  ;;  %s334_s9 = sshll.u32 %s413_s15, 4  ;;  %s335_s9 = int_to_ptr.vmem [resolvable:$false] %s334_s9 }
  0x29   : > { %p331_p10 = scmp.ne.s32.totalorder %s502_s30, %s330_s13  ;;  %s336_s17 = scalar_lea.vmem %s335_s9, 64 }
  0x2a   : > { %p337_p13 = scmp.lt.s32.totalorder %s502_s30, %s335_s9  ;;  %p338_p0 = scmp.lt.s32.totalorder %s336_s17, %s330_s13 }
  0x2b   : > { %p332_p11 = pnand %p331_p10, %p464_p4 }
  0x2c   : > { %p339_p1 = por %p338_p0, %p337_p13 }
  0x2d   : > { %p333_p12 = pneg %p332_p11 }
  0x2f   : > { %p340_p2 = pnand %p339_p1, %p333_p12 }
  0x31   : > { %343 = shalt.err (!%p340_p2)
}
  0x32   : > { %s344_s20 = scalar_lea.hbm %s151_s5, 32  ;;  %s348_s23 = scalar_lea.hbm %s546_s1, 64 }
  0x33   : > { %p345_p3 = scmp.ne.s32.totalorder %s151_s5, %s344_s20  ;;  %p349_p7 = scmp.lt.s32.totalorder %s151_s5, %s546_s1 }
  0x34   : > { %p350_p9 = scmp.lt.s32.totalorder %s348_s23, %s344_s20 }
  0x35   : > { %p346_p5 = pnand %p345_p3, %p464_p4 }
  0x36   : > { %p351_p10 = por %p350_p9, %p349_p7 }
  0x37   : > { %p347_p6 = pneg %p346_p5 }
  0x39   : > { %p352_p11 = pnand %p351_p10, %p347_p6 }
  0x3b   : > { %355 = shalt.err (!%p352_p11)
}
  0x3c   : > { %242 = dma.vmem_to_hbm [thread:$0]  (%p464_p4), %s502_s30, 32, %s151_s5, %s137_s12  }
  0x3d PF: > { %p254_p12 = scmp.ge.s32.totalorder %s410_s11, 2  ;;  %s165_s26 = sand.u32 1, %s390_s6  }
  0x3e   : > { %s166_s27 = scalar_lea.sflag [#allocation4], %s165_s26 }
  0x3f   : > { %p249_p13 = pnand %p254_p12, %p471_p8 }
  0x41   : > { %p250_p0 = pneg %p249_p13 }
  0x43   : > { %385 = dma.done.wait (%p250_p0), %s166_s27, 32  }
  0x44   : > { %387 = vsyncadd (%p250_p0), %s166_s27, 4294967264  ;;  %s15_s11 = sadd.s32 1, %s410_s11   ;;  %s551_s6 = smov %s394_s7 }
  0x45   : > { %p12_p1 = scmp.ge.s32.totalorder %s15_s11, 4   ;;  %s552_s7 = smov %s398_s8 }
  0x46   : > { %s553_s8 = smov %s477_s19  ;;  %s554_s9 = smov %s406_s10 }
  0x47   : > { %s555_s10 = smov %s557_s14  ;;  %14 = sbr.rel (!%p12_p1) target bundleno = 5 (0x5), region = 62 }
  0x4c   :  { %171 = vsyncpa [#allocation3], 1 }
  0x4d   :  { %173 = vsyncpa [#allocation3 + $0x1], 1 }
  0x4e   :  { %174 = vsyncpa [#allocation4], 1 }
  0x4f   :  { %176 = vsyncpa [#allocation4 + $0x1], 1 }

</bundles_post_ra>
